<compile_context>
chip_gen: v6e
topology: v6e:2x2x1
jax: 0.10.0
libtpu: 0.0.40
codegen_flags: <defaults>
</compile_context>

<pallas_src>
import math

import jax
import jax.numpy as jnp
from jax.experimental import pallas as pl
from jax.experimental.pallas import tpu as pltpu

ALPHA = 2.1
OMEGA = 14.0
EPSILON = 1.0
THETA = 0.5

_LN_TE = math.log(THETA / EPSILON)     # ln(theta/eps) = ln(0.5)
_INV_OMEGA = 1.0 / OMEGA
_INV_TE = EPSILON / THETA              # (theta/eps)^-1 = 2.0
_INV_EPS = 1.0 / EPSILON


def _round_up(x, m):
    return ((x + m - 1) // m) * m


def _awing_kernel(inv_m_ref, yp_ref, y_ref, o_ref):
    """AWing loss on a (TR, L) tile; one partial-sum block per grid step."""
    yp = yp_ref[...].astype(jnp.float32)        # (TR, L) raw predictions
    y = y_ref[...].astype(jnp.float32)          # (TR, L) targets
    inv_m = inv_m_ref[...]                      # (TR, 1) per-row 1/max (f32)

    # NormReLU: relu + per-sample max normalization.  The reciprocal is a
    # per-row scalar (hoisted in the wrapper) -> one multiply per element.
    yp = jnp.maximum(yp, 0.0) * inv_m

    delta = jnp.abs(y - yp)
    aly = ALPHA - y                             # alpha - y  (> 0 for y <= alpha)

    # (theta/eps)^aly lowered to a single EUP exp (constant log folded).
    pow_te = jnp.exp(aly * _LN_TE)

    # Branch 1: |y - yp| < theta
    #   omega * log(1 + (delta/omega)^aly), pow lowered to log+exp;
    #   delta == 0  ->  log = -inf, aly*(-inf) = -inf, exp = 0, loss = 0.
    log_d = jnp.log(delta * _INV_OMEGA)
    loss1 = OMEGA * jnp.log(1.0 + jnp.exp(aly * log_d))

    # Branch 2: |y - yp| >= theta
    #   (theta/eps)^(aly-1) == pow_te * (eps/theta)  -> no second pow.
    inv_denom = 1.0 / (1.0 + pow_te)
    A = OMEGA * inv_denom * aly * (pow_te * _INV_TE) * _INV_EPS
    C = THETA * A - OMEGA * jnp.log(1.0 + pow_te)
    loss2 = A * delta - C

    loss = jnp.where(delta < THETA, loss1, loss2)

    # Single cross-lane reduce per block, broadcast into a lane-dense
    # (1, 8, 128) partial-sum output block (wrapper reads [i, 0, 0]).
    o_ref[...] = jnp.zeros(o_ref.shape, o_ref.dtype) + jnp.sum(loss)


def awing_loss(y_pred, y, *, lane_tile=512, row_tile=512):
    """AWing loss matching the PyTorch module (activation='NormRelu')."""
    assert y_pred.shape == y.shape
    B = y_pred.shape[0]
    total = y_pred.size                      # == len(loss1) + len(loss2)

    yp2 = y_pred.reshape(B, -1)              # keep original dtype (bf16 ok);
    y2 = y.reshape(B, -1)                    # upcast happens in-kernel.
    F = yp2.shape[1]

    # Per-sample relu-max for NormReLU; reciprocal hoisted out of the kernel.
    maxv = jnp.max(jnp.maximum(yp2.astype(jnp.float32), 0.0),
                   axis=1, keepdims=True)
    inv_m = 1.0 / jnp.maximum(maxv, 1e-12)   # (B, 1) f32

    # ---- sublane-dense layout: (B, F) -> (rows, L) -----------------------
    L = min(lane_tile, _round_up(F, 128))
    Fp = _round_up(F, L)
    if Fp != F:                              # zero pad: y == yp == 0 -> loss 0
        yp2 = jnp.pad(yp2, ((0, 0), (0, Fp - F)))
        y2 = jnp.pad(y2, ((0, 0), (0, Fp - F)))
    rows_per_sample = Fp // L
    R = B * rows_per_sample
    yp_r = yp2.reshape(R, L)
    y_r = y2.reshape(R, L)
    inv_m_r = jnp.repeat(inv_m, rows_per_sample, axis=0)     # (R, 1)

    # Adaptive row tile: aim for <= row_tile rows/block with balanced blocks
    # (padding waste < 8 rows per block); TR is a multiple of 8 sublanes.
    num_blocks = -(-R // row_tile)
    TR = _round_up(-(-R // num_blocks), 8)
    R_pad = num_blocks * TR
    if R_pad != R:                           # zero-padded rows -> loss 0
        yp_r = jnp.pad(yp_r, ((0, R_pad - R), (0, 0)))
        y_r = jnp.pad(y_r, ((0, R_pad - R), (0, 0)))
        inv_m_r = jnp.pad(inv_m_r, ((0, R_pad - R), (0, 0)))

    # VMEM budget at the default tile (TR=512, L=512, f32): 2 inputs x 2 bufs
    # x 1 MiB + inv_m + output ~ 4.6 MiB -> well under every chip's default
    # scoped-VMEM limit.
    partials = pl.pallas_call(
        _awing_kernel,
        out_shape=jax.ShapeDtypeStruct((num_blocks, 8, 128), jnp.float32),
        grid_spec=pltpu.PrefetchScalarGridSpec(
            num_scalar_prefetch=0,
            grid=(num_blocks,),
            in_specs=[
                pl.BlockSpec((TR, 1), lambda i: (i, 0)),    # per-row 1/max
                pl.BlockSpec((TR, L), lambda i: (i, 0)),    # y_pred tile
                pl.BlockSpec((TR, L), lambda i: (i, 0)),    # y tile
            ],
            out_specs=pl.BlockSpec((1, 8, 128), lambda i: (i, 0, 0)),
        ),
        compiler_params=pltpu.CompilerParams(
            dimension_semantics=("parallel",)),
    )(inv_m_r, yp_r, y_r)

    return jnp.sum(partials[:, 0, 0]) / jnp.float32(total)


def _awing_ref(y_pred, y):
    """Pure-JAX reference mirroring the PyTorch forward."""
    B = y_pred.shape[0]
    x = jnp.maximum(y_pred.astype(jnp.float32), 0.0).reshape(B, -1)
    m = jnp.maximum(jnp.max(x, axis=1, keepdims=True), 1e-12)
    yp = (x * (1.0 / m)).reshape(y_pred.shape)
    y = y.astype(jnp.float32)

    delta = jnp.abs(y - yp)
    aly = ALPHA - y
    te = THETA / EPSILON
    pow_te = jnp.power(te, aly)
    loss1 = OMEGA * jnp.log(1.0 + jnp.power(delta / OMEGA, aly))
    A = (OMEGA * (1.0 / (1.0 + pow_te)) * aly
         * jnp.power(te, aly - 1.0) * (1.0 / EPSILON))
    C = THETA * A - OMEGA * jnp.log(1.0 + pow_te)
    loss2 = A * delta - C
    loss = jnp.where(delta < THETA, loss1, loss2)
    return jnp.sum(loss) / loss.size


if __name__ == "__main__":
    key = jax.random.PRNGKey(0)
    k1, k2 = jax.random.split(key)
    # Small NCHW heatmap-style inputs.
    y_pred = jax.random.normal(k1, (2, 4, 16, 16), dtype=jnp.float32)
    y = jax.random.uniform(k2, (2, 4, 16, 16), dtype=jnp.float32)

    out = awing_loss(y_pred, y)
    jax.block_until_ready(out)

    ref = _awing_ref(y_pred, y)
    assert jnp.allclose(out, ref, rtol=1e-5, atol=1e-5), (out, ref)
    print("KERNEL_OK")
</pallas_src>

<mosaic_0001>
module attributes {stable_mosaic.version = 11 : i64} {
  func.func @_awing_kernel(%arg0: i32, %arg1: memref<8x1xf32, #tpu.memory_space<vmem>>, %arg2: memref<8x512xf32, #tpu.memory_space<vmem>>, %arg3: memref<8x512xf32, #tpu.memory_space<vmem>>, %arg4: memref<1x8x128xf32, #tpu.memory_space<vmem>>) attributes {dimension_semantics = [#tpu.dimension_semantics<parallel>], iteration_bounds = array<i64: 1>, scalar_prefetch = 0 : i64, scratch_operands = 0 : i64, tpu.core_type = #tpu.core_type<tc>, window_params = [{transform_indices = @transform_0, window_bounds = array<i64: 8, 1>}, {transform_indices = @transform_1, window_bounds = array<i64: 8, 512>}, {transform_indices = @transform_2, window_bounds = array<i64: 8, 512>}, {transform_indices = @transform_3, window_bounds = array<i64: 1, 8, 128>}]} {
    %c0 = arith.constant 0 : index
    %c0_0 = arith.constant 0 : index
    %0 = vector.load %arg2[%c0, %c0_0] : memref<8x512xf32, #tpu.memory_space<vmem>>, vector<8x512xf32>
    %c0_1 = arith.constant 0 : index
    %c0_2 = arith.constant 0 : index
    %1 = vector.load %arg3[%c0_1, %c0_2] : memref<8x512xf32, #tpu.memory_space<vmem>>, vector<8x512xf32>
    %c0_3 = arith.constant 0 : index
    %c0_4 = arith.constant 0 : index
    %2 = vector.load %arg1[%c0_3, %c0_4] : memref<8x1xf32, #tpu.memory_space<vmem>>, vector<8x1xf32>
    %cst = arith.constant 0.000000e+00 : f32
    %3 = vector.broadcast %cst : f32 to vector<8x512xf32>
    %4 = arith.maximumf %0, %3 : vector<8x512xf32>
    %5 = vector.broadcast %2 : vector<8x1xf32> to vector<8x512xf32>
    %6 = arith.mulf %4, %5 : vector<8x512xf32>
    %7 = arith.subf %1, %6 : vector<8x512xf32>
    %8 = math.absf %7 : vector<8x512xf32>
    %cst_5 = arith.constant 2.100000e+00 : f32
    %9 = vector.broadcast %cst_5 : f32 to vector<8x512xf32>
    %10 = arith.subf %9, %1 : vector<8x512xf32>
    %cst_6 = arith.constant -0.693147182 : f32
    %11 = vector.broadcast %cst_6 : f32 to vector<8x512xf32>
    %12 = arith.mulf %10, %11 : vector<8x512xf32>
    %13 = math.exp %12 : vector<8x512xf32>
    %cst_7 = arith.constant 0.0714285746 : f32
    %14 = vector.broadcast %cst_7 : f32 to vector<8x512xf32>
    %15 = arith.mulf %8, %14 : vector<8x512xf32>
    %16 = math.log %15 : vector<8x512xf32>
    %17 = arith.mulf %10, %16 : vector<8x512xf32>
    %18 = math.exp %17 : vector<8x512xf32>
    %cst_8 = arith.constant 1.000000e+00 : f32
    %19 = vector.broadcast %cst_8 : f32 to vector<8x512xf32>
    %20 = arith.addf %19, %18 : vector<8x512xf32>
    %21 = math.log %20 : vector<8x512xf32>
    %cst_9 = arith.constant 1.400000e+01 : f32
    %22 = vector.broadcast %cst_9 : f32 to vector<8x512xf32>
    %23 = arith.mulf %22, %21 : vector<8x512xf32>
    %cst_10 = arith.constant 1.000000e+00 : f32
    %24 = vector.broadcast %cst_10 : f32 to vector<8x512xf32>
    %25 = arith.addf %24, %13 : vector<8x512xf32>
    %cst_11 = arith.constant 1.000000e+00 : f32
    %26 = vector.broadcast %cst_11 : f32 to vector<8x512xf32>
    %27 = arith.divf %26, %25 : vector<8x512xf32>
    %cst_12 = arith.constant 1.400000e+01 : f32
    %28 = vector.broadcast %cst_12 : f32 to vector<8x512xf32>
    %29 = arith.mulf %28, %27 : vector<8x512xf32>
    %30 = arith.mulf %29, %10 : vector<8x512xf32>
    %cst_13 = arith.constant 2.000000e+00 : f32
    %31 = vector.broadcast %cst_13 : f32 to vector<8x512xf32>
    %32 = arith.mulf %13, %31 : vector<8x512xf32>
    %33 = arith.mulf %30, %32 : vector<8x512xf32>
    %cst_14 = arith.constant 1.000000e+00 : f32
    %34 = vector.broadcast %cst_14 : f32 to vector<8x512xf32>
    %35 = arith.mulf %33, %34 : vector<8x512xf32>
    %cst_15 = arith.constant 5.000000e-01 : f32
    %36 = vector.broadcast %cst_15 : f32 to vector<8x512xf32>
    %37 = arith.mulf %36, %35 : vector<8x512xf32>
    %cst_16 = arith.constant 1.000000e+00 : f32
    %38 = vector.broadcast %cst_16 : f32 to vector<8x512xf32>
    %39 = arith.addf %38, %13 : vector<8x512xf32>
    %40 = math.log %39 : vector<8x512xf32>
    %cst_17 = arith.constant 1.400000e+01 : f32
    %41 = vector.broadcast %cst_17 : f32 to vector<8x512xf32>
    %42 = arith.mulf %41, %40 : vector<8x512xf32>
    %43 = arith.subf %37, %42 : vector<8x512xf32>
    %44 = arith.mulf %35, %8 : vector<8x512xf32>
    %45 = arith.subf %44, %43 : vector<8x512xf32>
    %cst_18 = arith.constant 5.000000e-01 : f32
    %46 = vector.broadcast %cst_18 : f32 to vector<8x512xf32>
    %47 = arith.cmpf olt, %8, %46 : vector<8x512xf32>
    %48 = arith.select %47, %23, %45 : vector<8x512xi1>, vector<8x512xf32>
    %cst_19 = arith.constant 0.000000e+00 : f32
    %49 = vector.broadcast %cst_19 : f32 to vector<1x8x128xf32>
    %50 = vector.shape_cast %48 : vector<8x512xf32> to vector<1x8x512xf32>
    %cst_20 = arith.constant dense<0.000000e+00> : vector<1xf32>
    %51 = vector.multi_reduction <add>, %50, %cst_20 [1, 2] : vector<1x8x512xf32> to vector<1xf32>
    %52 = vector.shape_cast %51 : vector<1xf32> to vector<1x1x1xf32>
    %53 = vector.extract %52[0, 0, 0] : f32 from vector<1x1x1xf32>
    %54 = vector.broadcast %53 : f32 to vector<1x8x128xf32>
    %55 = arith.addf %49, %54 : vector<1x8x128xf32>
    %c0_21 = arith.constant 0 : index
    %c0_22 = arith.constant 0 : index
    %c0_23 = arith.constant 0 : index
    %56 = vector.load %arg4[%c0_21, %c0_22, %c0_23] : memref<1x8x128xf32, #tpu.memory_space<vmem>>, vector<1x8x128xf32>
    tpu.vector_store %arg4[%c0_21, %c0_22, %c0_23], %55 {strides = array<i32>} : memref<1x8x128xf32, #tpu.memory_space<vmem>>, vector<1x8x128xf32>,
    return
  }
  func.func @transform_0(%arg0: i32) -> (i32, i32) {
    %c0_i32 = arith.constant 0 : i32
    %c0_i32_0 = arith.constant 0 : i32
    return %arg0, %c0_i32 : i32, i32
  }
  func.func @transform_1(%arg0: i32) -> (i32, i32) {
    %c0_i32 = arith.constant 0 : i32
    %c0_i32_0 = arith.constant 0 : i32
    return %arg0, %c0_i32 : i32, i32
  }
  func.func @transform_2(%arg0: i32) -> (i32, i32) {
    %c0_i32 = arith.constant 0 : i32
    %c0_i32_0 = arith.constant 0 : i32
    return %arg0, %c0_i32 : i32, i32
  }
  func.func @transform_3(%arg0: i32) -> (i32, i32, i32) {
    %c0_i32 = arith.constant 0 : i32
    %c0_i32_0 = arith.constant 0 : i32
    %c0_i32_1 = arith.constant 0 : i32
    return %arg0, %c0_i32, %c0_i32_0 : i32, i32, i32
  }
}

</mosaic_0001>

<bundles_post_ra>
// kernel: tpu_custom_call.1
= control target key start
LH: loop header
LB: loop body
LE: loop exit
PB: predicated region body
PF: predicated region fallthrough
CT: control target
= control target key end

     0   :  { %8 = vsyncpa [#allocation3], 0  ;;  %s421_s0 = inlined_call_operand.vmem [shape: f32[8,1], index: 0, kind: input, shape index: {}]   ;;  %s422_s1 = inlined_call_operand.hbm [shape: f32[8,512], index: 1, kind: input, shape index: {}]   ;;  %s423_s2 = inlined_call_operand.hbm [shape: f32[8,512], index: 2, kind: input, shape index: {}]   ;;  %s424_s3 = inlined_call_operand.hbm [shape: f32[1,8,128], index: 3, kind: output, shape index: {}]  }
   0x1   :  { %9 = vsyncpa [#allocation6], 0 }
   0x2   :  { %10 = vsyncpa [#allocation4], 0  ;;  %s341_s12 = smov [#allocation2]   ;;  %s342_s14 = smov [#allocation5]  }
   0x3   :  { %s19_s13 = sshll.u32 %s341_s12, 4  ;;  %s29_s15 = sshll.u32 %s342_s14, 4  ;;  %s20_s13 = int_to_ptr.vmem [resolvable:$true] %s19_s13  ;;  %s30_s15 = int_to_ptr.vmem [resolvable:$true] %s29_s15 }
   0x4   :  { %s283_s16 = scalar_lea.vmem %s20_s13, 512  ;;  %p288_p1 = scmp.lt.s32.totalorder %s20_s13, %s20_s13 }
   0x5   :  { %p284_p0 = scmp.ne.s32.totalorder %s20_s13, %s283_s16  ;;  %p289_p2 = scmp.lt.s32.totalorder %s283_s16, %s283_s16 }
   0x7   :  { %p290_p3 = por %p289_p2, %p288_p1 }
   0x9   :  { %p291_p4 = pnand %p290_p3, %p284_p0 }
   0xb   :  { %294 = shalt.err (!%p291_p4)
}
   0xc   :  { %22 = dma.hbm_to_vmem [thread:$0]  %s422_s1, 512, %s20_s13, [#allocation3]  }
   0xd   :  { %s303_s19 = scalar_lea.vmem %s30_s15, 512  ;;  %p308_p6 = scmp.lt.s32.totalorder %s30_s15, %s30_s15 }
   0xe   :  { %p304_p5 = scmp.ne.s32.totalorder %s30_s15, %s303_s19  ;;  %p309_p7 = scmp.lt.s32.totalorder %s303_s19, %s303_s19 }
  0x10   :  { %p310_p8 = por %p309_p7, %p308_p6 }
  0x12   :  { %p311_p9 = pnand %p310_p8, %p304_p5 }
  0x14   :  { %314 = shalt.err (!%p311_p9)
}
  0x15   :  { %32 = dma.hbm_to_vmem [thread:$0]  %s423_s2, 512, %s30_s15, [#allocation6]  }
  0x16   :  { %335 = dma.done.wait [#allocation3], 512  }
  0x17   :  { %336 = vsyncadd [#allocation3], 4294966784 }
  0x18   :  { %337 = dma.done.wait [#allocation6], 512  }
  0x19   :  { %338 = vsyncadd [#allocation6], 4294966784  ;;  %v343_v0 = vmov 0   ;;  %v47_v1 = vld [vmem:[%s421_s0] sm:$0xff]  ;;  %v44_v3 = vld [vmem:[#allocation5 + $0x8] sm:$0xff]  ;;  %s344_s0 = smov [#allocation7]  }
  0x1a   :  { %226 = vset.pattern.permute.xlu0 %v343_v0  ;;  %v43_v2 = vld [vmem:[#allocation5] sm:$0xff]  ;;  %v45_v4 = vld [vmem:[#allocation5 + $0x10] sm:$0xff]  ;;  %v40_v7 = vld [vmem:[#allocation2 + $0x8] sm:$0xff]  ;;  %v376_v11 = vsub.f32 2.1, %v44_v3  ;;  %s210_s1 = sshll.u32 %s344_s0, 4  ;;  %s211_s1 = int_to_ptr.vmem [resolvable:$true] %s210_s1 }
  0x1b   :  { %54 = vperm.xlu0 %226, %v47_v1   ;;  %v374_v5 = vsub.f32 2.1, %v43_v2  ;;  %v39_v6 = vld [vmem:[#allocation2] sm:$0xff]  ;;  %v46_v8 = vld [vmem:[#allocation5 + $0x18] sm:$0xff]  ;;  %v41_v9 = vld [vmem:[#allocation2 + $0x10] sm:$0xff]  ;;  %v49_v16 = vmax.f32 %v40_v7, 0.0  ;;  %p320_p11 = scmp.lt.s32.totalorder %s211_s1, %s211_s1 }
  0x1c   :  { %v42_v10 = vld [vmem:[#allocation2 + $0x18] sm:$0xff]  ;;  %v378_v12 = vsub.f32 2.1, %v45_v4  ;;  %v380_v13 = vsub.f32 2.1, %v46_v8  ;;  %v48_v15 = vmax.f32 %v39_v6, 0.0 }
  0x1d   :  { %v73_v14 = vmul.f32 -0.6931472, %v374_v5  ;;  %v50_v17 = vmax.f32 %v41_v9, 0.0  ;;  %v51_v18 = vmax.f32 %v42_v10, 0.0  ;;  %v74_v19 = vmul.f32 -0.6931472, %v376_v11 }
  0x1e   :  { %v75_v20 = vmul.f32 -0.6931472, %v378_v12  ;;  %v76_v22 = vmul.f32 -0.6931472, %v380_v13  ;;  %s315_s24 = scalar_lea.vmem %s211_s1, 128 }
  0x1f   :  { %v77_v23 = vmul.f32 1.442695, %v73_v14  ;;  %v79_v28 = vmul.f32 1.442695, %v74_v19  ;;  %p316_p10 = scmp.ne.s32.totalorder %s211_s1, %s315_s24  ;;  %p321_p12 = scmp.lt.s32.totalorder %s315_s24, %s315_s24 }
  0x20   :  { %v81_v29 = vmul.f32 1.442695, %v75_v20  ;;  %v83_v34 = vmul.f32 1.442695, %v76_v22 }
  0x21   :  { %227 = vpow2.f32 %v77_v23  ;;  %p322_p13 = por %p321_p12, %p320_p11 }
  0x22   :  { %229 = vpow2.f32 %v79_v28 }
  0x23   :  { %231 = vpow2.f32 %v81_v29  ;;  %p323_p0 = pnand %p322_p13, %p316_p10 }
  0x24   :  { %233 = vpow2.f32 %v83_v34 }
  0x2e   :  { %v228_v43 = vpop.eup %227 }
  0x2f   :  { %v230_v44 = vpop.eup %229  ;;  %v125_v47 = vadd.f32 1.0, %v228_v43  ;;  %v145_v22 = vmul.f32 2.0, %v228_v43 }
  0x30   :  { %v232_v45 = vpop.eup %231  ;;  %v126_v49 = vadd.f32 1.0, %v230_v44 }
  0x31   :  { %v398_v46 = vpop.eup %233  ;;  %v127_v52 = vadd.f32 1.0, %v232_v45  ;;  %v147_v29 = vmul.f32 2.0, %v232_v45 }
  0x32   :  { %v128_v55 = vadd.f32 1.0, %v398_v46 }
  0x96   :  { %v55_v21 = vpop.permute.xlu0 %54 }
  0x97   :  { %v57_v24 = vmul.f32 %v55_v21, %v48_v15  ;;  %v58_v25 = vmul.f32 %v55_v21, %v49_v16  ;;  %v59_v26 = vmul.f32 %v55_v21, %v50_v17  ;;  %v60_v27 = vmul.f32 %v55_v21, %v51_v18 }
  0x99   :  { %v61_v30 = vsub.f32 %v43_v2, %v57_v24  ;;  %v62_v31 = vsub.f32 %v44_v3, %v58_v25  ;;  %v63_v32 = vsub.f32 %v45_v4, %v59_v26  ;;  %v64_v33 = vsub.f32 %v46_v8, %v60_v27 }
  0x9a   :  { %v146_v26 = vmul.f32 2.0, %v230_v44 }
  0x9b   :  { %v386_v35 = vand.u32 2147483647, %v61_v30  ;;  %v388_v36 = vand.u32 2147483647, %v62_v31  ;;  %v390_v37 = vand.u32 2147483647, %v63_v32 }
  0x9c   :  { %v392_v38 = vand.u32 2147483647, %v64_v33 }
  0x9d   :  { %v85_v39 = vmul.f32 0.071428575, %v386_v35  ;;  %v86_v40 = vmul.f32 0.071428575, %v388_v36  ;;  %v87_v41 = vmul.f32 0.071428575, %v390_v37 }
  0x9e   :  { %v88_v42 = vmul.f32 0.071428575, %v392_v38  ;;  %vm181_vm0 = vcmp.lt.f32.partialorder %v386_v35, 0.5  ;;  %vm182_vm1 = vcmp.lt.f32.partialorder %v388_v36, 0.5  ;;  %vm183_vm2 = vcmp.lt.f32.partialorder %v390_v37, 0.5 }
  0x9f   :  { %235 = vlog2.f32 %v85_v39  ;;  %vm184_vm3 = vcmp.lt.f32.partialorder %v392_v38, 0.5 }
  0xa0   :  { %237 = vlog2.f32 %v86_v40 }
  0xa1   :  { %239 = vlog2.f32 %v87_v41 }
  0xa2   :  { %241 = vlog2.f32 %v88_v42 }
  0xa3   :  { %243 = vrcp.f32 %v125_v47 }
  0xa4   :  { %245 = vrcp.f32 %v126_v49 }
  0xa5   :  { %247 = vrcp.f32 %v127_v52 }
  0xa6   :  { %249 = vrcp.f32 %v128_v55 }
  0xac   :  { %v236_v48 = vpop.eup %235 }
  0xad   :  { %v238_v50 = vpop.eup %237  ;;  %v90_v51 = vmul.f32 0.6931472, %v236_v48 }
  0xae   :  { %v240_v53 = vpop.eup %239  ;;  %v92_v54 = vmul.f32 0.6931472, %v238_v50 }
  0xaf   :  { %v242_v56 = vpop.eup %241  ;;  %v94_v57 = vmul.f32 0.6931472, %v240_v53  ;;  %v97_v58 = vmul.f32 %v90_v51, %v374_v5 }
  0xb0   :  { %v96_v59 = vmul.f32 0.6931472, %v242_v56  ;;  %v98_v60 = vmul.f32 %v92_v54, %v376_v11  ;;  %v244_v3 = vpop.eup %243 }
  0xb1   :  { %v99_v61 = vmul.f32 %v94_v57, %v378_v12  ;;  %v101_v62 = vmul.f32 1.442695, %v97_v58  ;;  %v246_v4 = vpop.eup %245  ;;  %v137_v8 = vmul.f32 14.0, %v244_v3 }
  0xb2   :  { %v100_v63 = vmul.f32 %v96_v59, %v380_v13  ;;  %v103_v0 = vmul.f32 1.442695, %v98_v60  ;;  %v248_v6 = vpop.eup %247  ;;  %v138_v10 = vmul.f32 14.0, %v246_v4 }
  0xb3   :  { %251 = vpow2.f32 %v101_v62  ;;  %v105_v1 = vmul.f32 1.442695, %v99_v61  ;;  %v250_v7 = vpop.eup %249  ;;  %v139_v17 = vmul.f32 14.0, %v248_v6  ;;  %v141_v21 = vmul.f32 %v137_v8, %v374_v5 }
  0xb4   :  { %253 = vpow2.f32 %v103_v0  ;;  %v107_v2 = vmul.f32 1.442695, %v100_v63  ;;  %v140_v19 = vmul.f32 14.0, %v250_v7  ;;  %v142_v25 = vmul.f32 %v138_v10, %v376_v11 }
  0xb5   :  { %255 = vpow2.f32 %v105_v1  ;;  %v143_v31 = vmul.f32 %v139_v17, %v378_v12  ;;  %v148_v5 = vmul.f32 2.0, %v398_v46  ;;  %v149_v34 = vmul.f32 %v145_v22, %v141_v21 }
  0xb6   :  { %257 = vpow2.f32 %v107_v2  ;;  %v144_v32 = vmul.f32 %v140_v19, %v380_v13  ;;  %v150_v40 = vmul.f32 %v146_v26, %v142_v25 }
  0xb7   :  { %259 = vlog2.f32 %v125_v47  ;;  %v151_v11 = vmul.f32 %v147_v29, %v143_v31  ;;  %v153_v47 = vmul.f32 0.5, %v149_v34  ;;  %v173_v13 = vmul.f32 %v149_v34, %v386_v35 }
  0xb8   :  { %261 = vlog2.f32 %v126_v49  ;;  %v152_v42 = vmul.f32 %v148_v5, %v144_v32  ;;  %v154_v45 = vmul.f32 0.5, %v150_v40  ;;  %v174_v54 = vmul.f32 %v150_v40, %v388_v36 }
  0xb9   :  { %263 = vlog2.f32 %v127_v52  ;;  %v155_v50 = vmul.f32 0.5, %v151_v11  ;;  %v175_v62 = vmul.f32 %v151_v11, %v390_v37 }
  0xba   :  { %265 = vlog2.f32 %v128_v55  ;;  %v156_v12 = vmul.f32 0.5, %v152_v42  ;;  %v176_v2 = vmul.f32 %v152_v42, %v392_v38 }
  0xc0   :  { %v252_v9 = vpop.eup %251 }
  0xc1   :  { %v254_v14 = vpop.eup %253  ;;  %v109_v15 = vadd.f32 1.0, %v252_v9 }
  0xc2   :  { %v256_v16 = vpop.eup %255  ;;  %v110_v18 = vadd.f32 1.0, %v254_v14 }
  0xc3   :  { %v258_v20 = vpop.eup %257  ;;  %v111_v23 = vadd.f32 1.0, %v256_v16  ;;  %267 = vlog2.f32 %v109_v15 }
  0xc4   :  { %v260_v24 = vpop.eup %259  ;;  %v112_v27 = vadd.f32 1.0, %v258_v20  ;;  %269 = vlog2.f32 %v110_v18 }
  0xc5   :  { %v262_v28 = vpop.eup %261  ;;  %271 = vlog2.f32 %v111_v23  ;;  %v158_v39 = vmul.f32 0.6931472, %v260_v24 }
  0xc6   :  { %v264_v30 = vpop.eup %263  ;;  %273 = vlog2.f32 %v112_v27  ;;  %v160_v41 = vmul.f32 0.6931472, %v262_v28 }
  0xc7   :  { %v266_v33 = vpop.eup %265  ;;  %v162_v43 = vmul.f32 0.6931472, %v264_v30  ;;  %v165_v48 = vmul.f32 14.0, %v158_v39 }
  0xc8   :  { %v164_v44 = vmul.f32 0.6931472, %v266_v33  ;;  %v166_v49 = vmul.f32 14.0, %v160_v41 }
  0xc9   :  { %v167_v51 = vmul.f32 14.0, %v162_v43  ;;  %v169_v46 = vsub.f32 %v153_v47, %v165_v48 }
  0xca   :  { %v168_v52 = vmul.f32 14.0, %v164_v44  ;;  %v170_v55 = vsub.f32 %v154_v45, %v166_v49 }
  0xcb   :  { %v171_v60 = vsub.f32 %v155_v50, %v167_v51  ;;  %v177_v3 = vsub.f32 %v173_v13, %v169_v46 }
  0xcc   :  { %v172_v61 = vsub.f32 %v156_v12, %v168_v52  ;;  %v178_v7 = vsub.f32 %v174_v54, %v170_v55 }
  0xcd   :  { %v179_v14 = vsub.f32 %v175_v62, %v171_v60 }
  0xce   :  { %v180_v17 = vsub.f32 %v176_v2, %v172_v61 }
  0xd0   :  { %v268_v53 = vpop.eup %267 }
  0xd1   :  { %v270_v56 = vpop.eup %269  ;;  %v114_v57 = vmul.f32 0.6931472, %v268_v53 }
  0xd2   :  { %v272_v58 = vpop.eup %271  ;;  %v116_v59 = vmul.f32 0.6931472, %v270_v56 }
  0xd3   :  { %v274_v63 = vpop.eup %273  ;;  %v118_v0 = vmul.f32 0.6931472, %v272_v58  ;;  %v121_v1 = vmul.f32 14.0, %v114_v57 }
  0xd4   :  { %v120_v4 = vmul.f32 0.6931472, %v274_v63  ;;  %v122_v6 = vmul.f32 14.0, %v116_v59 }
  0xd5   :  { %v123_v8 = vmul.f32 14.0, %v118_v0  ;;  %v185_v9 = vsel %vm181_vm0, %v121_v1, %v177_v3 }
  0xd6   :  { %v124_v10 = vmul.f32 14.0, %v120_v4  ;;  %v186_v15 = vsel %vm182_vm1, %v122_v6, %v178_v7 }
  0xd7   :  { %v189_v16 = vadd.f32 %v186_v15, %v185_v9  ;;  %v187_v18 = vsel %vm183_vm2, %v123_v8, %v179_v14 }
  0xd8   :  { %v188_v20 = vsel %vm184_vm3, %v124_v10, %v180_v17 }
  0xd9   :  { %v190_v19 = vadd.f32 %v189_v16, %v187_v18 }
  0xdb   :  { %v191_v21 = vadd.f32 %v190_v19, %v188_v20 }
  0xdd   :  { %192 = vadd.xlane.f32.xlu0 %v191_v21 }
 0x166   :  { %v193_v22 = vpop.xlane.xlu0 %192 }
 0x167   :  { %v194_v35 = vrot.slane %v193_v22, 4 }
 0x169   :  { %v195_v23 = vadd.f32 %v194_v35, %v193_v22 }
 0x16b   :  { %v196_v24 = vrot.slane %v195_v23, 2 }
 0x16d   :  { %v197_v36 = vadd.f32 %v196_v24, %v195_v23 }
 0x16f   :  { %v198_v25 = vrot.slane %v197_v36, 1 }
 0x171   :  { %v199_v26 = vadd.f32 %v198_v25, %v197_v36 }
 0x173   :  { %220 = vpush %v199_v26 }
 0x1a4   :  { %s221_s2 = spop %220 }
 0x1a5   :  { %v201_v37 = vstv %s221_s2 }
 0x1a6   :  { %203 = vst [vmem:[#allocation7] sm:$0xff] %v201_v37 }
 0x1a7   :  { %326 = shalt.err (!%p323_p0)
}
 0x1a8   :  { %213 = dma.vmem_to_hbm [thread:$0]  %s211_s1, 128, %s424_s3, [#allocation4]  }
 0x1a9   :  { %339 = dma.done.wait [#allocation4], 128  }
 0x1aa   :  { %340 = vsyncadd [#allocation4], 4294967168 }
 0x1ab   :  { %217 = vsyncpa [#allocation3], 1 }
 0x1ac   :  { %218 = vsyncpa [#allocation6], 1 }
 0x1ad   :  { %219 = vsyncpa [#allocation4], 1 }

</bundles_post_ra>
